<compile_context>
chip_gen: v7x
topology: tpu7x:2x2x1
jax: 0.10.0
libtpu: 0.0.40
codegen_flags: <defaults>
</compile_context>

<pallas_src>
import functools

import jax
import jax.numpy as jnp
import numpy as np
from jax.experimental import pallas as pl
from jax.experimental.pallas import tpu as pltpu


def _confs_mse_kernel(w_ref, pred_ref, gt_ref, out_ref, *, apply_mask):
    """One grid step: squared-error partial sum for one block of batch rows.

    w_ref:    (bb, J, 1)      target_weight for this batch block
    pred_ref: (bb, M, J, HW)  all hypotheses for this batch block
    gt_ref:   (bb, J, HW)     gt confidences (fetched once, reused for all M)
    out_ref:  (1, 8, 128)     lane-dense per-block partial sum (scalar broadcast)
    """
    pred = pred_ref[...].astype(jnp.float32)                    # (bb, M, J, HW)
    gt = gt_ref[...].astype(jnp.float32)                        # (bb, J, HW)

    if apply_mask:
        mask = w_ref[...].astype(jnp.float32)[:, None, :, :]    # (bb, 1, J, 1)
        pred = pred * mask

    diff = pred - gt[:, None, :, :]                             # broadcast over M
    sq = diff * diff

    # Fold batch rows + hypotheses with pure elementwise (VPU) adds into a
    # lane-dense (J, HW) slab, then a single cross-lane/sublane reduce.
    acc = jnp.sum(sq, axis=(0, 1))                              # (J, HW)
    total = jnp.sum(acc)                                        # scalar (XLU)

    out_ref[...] = jnp.full(out_ref.shape, total, jnp.float32)


def confs_mse_loss(pred_conf, gt_conf, target_weight, *, reg_invis_conf_to_zero,
                   block_bytes_cap=1 << 20):
    """JAX/Pallas equivalent of ConfsMSELoss.forward."""
    B, M, J, H, W = pred_conf.shape
    HW = H * W

    # Glue: flatten spatial dims (lane-dense last axis), per-joint weight column.
    pred = pred_conf.reshape(B, M, J, HW)
    gt = gt_conf.reshape(B, J, HW)
    w = target_weight.reshape(B, J, 1).astype(pred_conf.dtype)

    # Largest divisor of B whose pred block stays under block_bytes_cap
    # (at least 1 row per block).
    row_bytes = M * J * HW * pred.dtype.itemsize
    bb = 1
    for d in range(1, B + 1):
        if B % d == 0 and d * row_bytes <= block_bytes_cap:
            bb = d
    nb = B // bb

    kernel = functools.partial(
        _confs_mse_kernel, apply_mask=not reg_invis_conf_to_zero
    )

    partials = pl.pallas_call(
        kernel,
        out_shape=jax.ShapeDtypeStruct((nb, 8, 128), jnp.float32),
        grid_spec=pltpu.PrefetchScalarGridSpec(
            num_scalar_prefetch=0,
            grid=(nb,),
            in_specs=[
                pl.BlockSpec((bb, J, 1), lambda i: (i, 0, 0)),         # target_weight
                pl.BlockSpec((bb, M, J, HW), lambda i: (i, 0, 0, 0)),  # pred_conf
                pl.BlockSpec((bb, J, HW), lambda i: (i, 0, 0)),        # gt_conf
            ],
            out_specs=pl.BlockSpec((1, 8, 128), lambda i: (i, 0, 0)),
        ),
        compiler_params=pltpu.CompilerParams(
            dimension_semantics=("parallel",),
            vmem_limit_bytes=32 * 1024 * 1024,
        ),
    )(w, pred, gt)

    sq_sum = jnp.sum(partials[:, 0, 0])
    n_elems = B * M * J * HW
    return 0.5 * sq_sum / jnp.float32(n_elems)


def _reference_loss(pred_conf, gt_conf, target_weight, *, reg_invis_conf_to_zero):
    """Pure-JAX reference mirroring the PyTorch code."""
    B, M, J, H, W = pred_conf.shape
    conf_mask = target_weight[:, None, :, None, None]            # [B,1,J,1,1]
    gt = jnp.broadcast_to(gt_conf[:, None], (B, M, J, H, W))     # repeat over M
    pred = pred_conf if reg_invis_conf_to_zero else pred_conf * conf_mask
    return 0.5 * jnp.mean((pred - gt) ** 2)


if __name__ == "__main__":
    # Small shapes consistent with the forward pass.
    B, M, J, H, W = 2, 3, 8, 16, 16

    key = jax.random.PRNGKey(0)
    k1, k2, k3 = jax.random.split(key, 3)
    pred_conf = jax.random.normal(k1, (B, M, J, H, W), dtype=jnp.float32)
    gt_conf = jax.random.normal(k2, (B, J, H, W), dtype=jnp.float32)
    # Visibility weights in {0, 1}, like typical pose target_weight.
    target_weight = jax.random.bernoulli(k3, 0.75, (B, J)).astype(jnp.float32)

    for flag in (False, True):
        # Default cap: whole problem fits one grid step (single big block).
        loss = confs_mse_loss(
            pred_conf, gt_conf, target_weight, reg_invis_conf_to_zero=flag
        )
        loss = jax.block_until_ready(loss)
        ref = _reference_loss(
            pred_conf, gt_conf, target_weight, reg_invis_conf_to_zero=flag
        )
        np.testing.assert_allclose(
            np.asarray(loss), np.asarray(ref), rtol=1e-4, atol=1e-6
        )

        # Force multiple batch blocks to exercise the multi-step / parallel path.
        loss_mb = confs_mse_loss(
            pred_conf, gt_conf, target_weight,
            reg_invis_conf_to_zero=flag, block_bytes_cap=16 * 1024,
        )
        loss_mb = jax.block_until_ready(loss_mb)
        np.testing.assert_allclose(
            np.asarray(loss_mb), np.asarray(ref), rtol=1e-4, atol=1e-6
        )

    print("KERNEL_OK")
</pallas_src>

<mosaic_0001>
module attributes {stable_mosaic.version = 11 : i64} {
  func.func @_confs_mse_kernel(%arg0: i32, %arg1: memref<2x8x1xf32, #tpu.memory_space<vmem>>, %arg2: memref<2x3x8x256xf32, #tpu.memory_space<vmem>>, %arg3: memref<2x8x256xf32, #tpu.memory_space<vmem>>, %arg4: memref<1x8x128xf32, #tpu.memory_space<vmem>>) attributes {dimension_semantics = [#tpu.dimension_semantics<parallel>], iteration_bounds = array<i64: 1>, scalar_prefetch = 0 : i64, scratch_operands = 0 : i64, tpu.core_type = #tpu.core_type<tc>, window_params = [{transform_indices = @transform_0, window_bounds = array<i64: 2, 8, 1>}, {transform_indices = @transform_1, window_bounds = array<i64: 2, 3, 8, 256>}, {transform_indices = @transform_2, window_bounds = array<i64: 2, 8, 256>}, {transform_indices = @transform_3, window_bounds = array<i64: 1, 8, 128>}]} {
    %c0 = arith.constant 0 : index
    %c0_0 = arith.constant 0 : index
    %c0_1 = arith.constant 0 : index
    %c0_2 = arith.constant 0 : index
    %0 = vector.load %arg2[%c0, %c0_0, %c0_1, %c0_2] : memref<2x3x8x256xf32, #tpu.memory_space<vmem>>, vector<2x3x8x256xf32>
    %c0_3 = arith.constant 0 : index
    %c0_4 = arith.constant 0 : index
    %c0_5 = arith.constant 0 : index
    %1 = vector.load %arg3[%c0_3, %c0_4, %c0_5] : memref<2x8x256xf32, #tpu.memory_space<vmem>>, vector<2x8x256xf32>
    %c0_6 = arith.constant 0 : index
    %c0_7 = arith.constant 0 : index
    %c0_8 = arith.constant 0 : index
    %2 = vector.load %arg1[%c0_6, %c0_7, %c0_8] : memref<2x8x1xf32, #tpu.memory_space<vmem>>, vector<2x8x1xf32>
    %3 = vector.shape_cast %2 : vector<2x8x1xf32> to vector<2x1x8x1xf32>
    %4 = vector.broadcast %3 : vector<2x1x8x1xf32> to vector<2x3x8x256xf32>
    %5 = arith.mulf %0, %4 : vector<2x3x8x256xf32>
    %6 = vector.shape_cast %1 : vector<2x8x256xf32> to vector<2x1x8x256xf32>
    %7 = vector.broadcast %6 : vector<2x1x8x256xf32> to vector<2x3x8x256xf32>
    %8 = arith.subf %5, %7 : vector<2x3x8x256xf32>
    %9 = arith.mulf %8, %8 : vector<2x3x8x256xf32>
    %cst = arith.constant dense<0.000000e+00> : vector<8x256xf32>
    %10 = vector.multi_reduction <add>, %9, %cst [0, 1] : vector<2x3x8x256xf32> to vector<8x256xf32>
    %11 = vector.shape_cast %10 : vector<8x256xf32> to vector<1x8x256xf32>
    %cst_9 = arith.constant dense<0.000000e+00> : vector<1xf32>
    %12 = vector.multi_reduction <add>, %11, %cst_9 [1, 2] : vector<1x8x256xf32> to vector<1xf32>
    %13 = vector.shape_cast %12 : vector<1xf32> to vector<1x1x1xf32>
    %14 = vector.extract %13[0, 0, 0] : f32 from vector<1x1x1xf32>
    %15 = vector.broadcast %14 : f32 to vector<1x8x128xf32>
    %c0_10 = arith.constant 0 : index
    %c0_11 = arith.constant 0 : index
    %c0_12 = arith.constant 0 : index
    %16 = vector.load %arg4[%c0_10, %c0_11, %c0_12] : memref<1x8x128xf32, #tpu.memory_space<vmem>>, vector<1x8x128xf32>
    tpu.vector_store %arg4[%c0_10, %c0_11, %c0_12], %15 {strides = array<i32>} : memref<1x8x128xf32, #tpu.memory_space<vmem>>, vector<1x8x128xf32>,
    return
  }
  func.func @transform_0(%arg0: i32) -> (i32, i32, i32) {
    %c0_i32 = arith.constant 0 : i32
    %c0_i32_0 = arith.constant 0 : i32
    %c0_i32_1 = arith.constant 0 : i32
    return %arg0, %c0_i32, %c0_i32_0 : i32, i32, i32
  }
  func.func @transform_1(%arg0: i32) -> (i32, i32, i32, i32) {
    %c0_i32 = arith.constant 0 : i32
    %c0_i32_0 = arith.constant 0 : i32
    %c0_i32_1 = arith.constant 0 : i32
    %c0_i32_2 = arith.constant 0 : i32
    return %arg0, %c0_i32, %c0_i32_0, %c0_i32_1 : i32, i32, i32, i32
  }
  func.func @transform_2(%arg0: i32) -> (i32, i32, i32) {
    %c0_i32 = arith.constant 0 : i32
    %c0_i32_0 = arith.constant 0 : i32
    %c0_i32_1 = arith.constant 0 : i32
    return %arg0, %c0_i32, %c0_i32_0 : i32, i32, i32
  }
  func.func @transform_3(%arg0: i32) -> (i32, i32, i32) {
    %c0_i32 = arith.constant 0 : i32
    %c0_i32_0 = arith.constant 0 : i32
    %c0_i32_1 = arith.constant 0 : i32
    return %arg0, %c0_i32, %c0_i32_0 : i32, i32, i32
  }
}

</mosaic_0001>

<bundles_post_ra>
// kernel: tpu_custom_call.1
= control target key start
LH: loop header
LB: loop body
LE: loop exit
PB: predicated region body
PF: predicated region fallthrough
CT: control target
= control target key end

     0   :  { %8 = vsyncpa [#allocation3], 0  ;;  %s294_s0 = inlined_call_operand.vmem [shape: f32[2,8,1], index: 0, kind: input, shape index: {}]   ;;  %s295_s1 = inlined_call_operand.hbm [shape: f32[2,3,8,256], index: 1, kind: input, shape index: {}]   ;;  %s296_s2 = inlined_call_operand.hbm [shape: f32[2,8,256], index: 2, kind: input, shape index: {}]   ;;  %s297_s3 = inlined_call_operand.hbm [shape: f32[1,8,128], index: 3, kind: output, shape index: {}]  }
   0x1   :  { %9 = vsyncpa [#allocation6], 0 }
   0x2   :  { %10 = vsyncpa [#allocation4], 0  ;;  %s226_s12 = smov [#allocation2]   ;;  %s154_s16 = scalar_lea.hbm %s295_s1, 1536 }
   0x3   :  { %s18_s13 = sshll.u32 %s226_s12, 4  ;;  %p155_p0 = scmp.ne.s32.totalorder %s295_s1, %s154_s16  ;;  %s19_s13 = int_to_ptr.vmem [resolvable:$true] %s18_s13 }
   0x4   :  { %p158_p1 = scmp.lt.u32.totalorder %s154_s16, %s295_s1 }
   0x6   :  { %p160_p2 = pnand %p158_p1, %p155_p0 }
   0x8   :  { %163 = shalt.err (!%p160_p2)
}
   0x9   :  { %s164_s21 = scalar_lea.vmem %s19_s13, 1536  ;;  %p169_p4 = scmp.lt.s32.totalorder %s19_s13, %s19_s13 }
   0xa   :  { %p165_p3 = scmp.ne.s32.totalorder %s19_s13, %s164_s21  ;;  %p170_p5 = scmp.lt.s32.totalorder %s164_s21, %s164_s21 }
   0xc   :  { %p171_p6 = por %p170_p5, %p169_p4 }
   0xe   :  { %p172_p7 = pnand %p171_p6, %p165_p3 }
  0x10   :  { %175 = shalt.err (!%p172_p7)
}
  0x11   :  { %s227_s22 = smov 256   ;;  %s228_s23 = smov 16  }
  0x12   :  { %24 = dma.hbm_to_vmem [thread:$0]  %s295_s1, 1536, %s19_s13, [#allocation3], %s227_s22, %s227_s22, %s228_s23  }
  0x13   :  { %s229_s26 = smov [#allocation5]   ;;  %s176_s30 = scalar_lea.hbm %s296_s2, 512 }
  0x14   :  { %s30_s27 = sshll.u32 %s229_s26, 4  ;;  %p177_p8 = scmp.ne.s32.totalorder %s296_s2, %s176_s30  ;;  %s31_s27 = int_to_ptr.vmem [resolvable:$true] %s30_s27 }
  0x15   :  { %p180_p9 = scmp.lt.u32.totalorder %s176_s30, %s296_s2 }
  0x17   :  { %p182_p10 = pnand %p180_p9, %p177_p8 }
  0x19   :  { %185 = shalt.err (!%p182_p10)
}
  0x1a   :  { %s186_s8 = scalar_lea.vmem %s31_s27, 512  ;;  %p191_p12 = scmp.lt.s32.totalorder %s31_s27, %s31_s27 }
  0x1b   :  { %p187_p11 = scmp.ne.s32.totalorder %s31_s27, %s186_s8  ;;  %p192_p13 = scmp.lt.s32.totalorder %s186_s8, %s186_s8 }
  0x1d   :  { %p193_p0 = por %p192_p13, %p191_p12 }
  0x1f   :  { %p194_p1 = pnand %p193_p0, %p187_p11 }
  0x21   :  { %197 = shalt.err (!%p194_p1)
}
  0x22   :  { %36 = dma.hbm_to_vmem [thread:$0]  %s296_s2, 512, %s31_s27, [#allocation6], %s227_s22, %s227_s22, %s228_s23  }
  0x23   :  { %220 = dma.done.wait [#allocation3], 1536  }
  0x24   :  { %221 = vsyncadd [#allocation3], 4294965760 }
  0x25   :  { %222 = dma.done.wait [#allocation6], 512  }
  0x26   :  { %223 = vsyncadd [#allocation6], 4294966784  ;;  %v230_v0 = vmov 0   ;;  %v59_v1 = vld [vmem:[%s294_s0] sm:$0xff]  ;;  %v60_v2 = vld [vmem:[%s294_s0 + $0x8] sm:$0xff]  ;;  %s231_s0 = smov [#allocation7]  }
  0x27   :  { %153 = vset.pattern.permute.xlu0 %v230_v0  ;;  %v43_v3 = vld [vmem:[#allocation2] sm:$0xff]  ;;  %v44_v4 = vld [vmem:[#allocation2 + $0x8] sm:$0xff]  ;;  %v45_v5 = vld [vmem:[#allocation2 + $0x10] sm:$0xff]  ;;  %s135_s2 = sshll.u32 %s231_s0, 4  ;;  %s136_s2 = int_to_ptr.vmem [resolvable:$true] %s135_s2 }
  0x28   :  { %63 = vperm.xlu0 %153, %v59_v1   ;;  %v46_v6 = vld [vmem:[#allocation2 + $0x18] sm:$0xff]  ;;  %v47_v7 = vld [vmem:[#allocation2 + $0x20] sm:$0xff]  ;;  %v48_v8 = vld [vmem:[#allocation2 + $0x28] sm:$0xff]  ;;  %s198_s15 = scalar_lea.vmem %s136_s2, 128  ;;  %p203_p3 = scmp.lt.s32.totalorder %s136_s2, %s136_s2 }
  0x29   :  { %v55_v10 = vld [vmem:[#allocation5] sm:$0xff]  ;;  %v56_v11 = vld [vmem:[#allocation5 + $0x8] sm:$0xff]  ;;  %v49_v18 = vld [vmem:[#allocation2 + $0x30] sm:$0xff]  ;;  %p199_p2 = scmp.ne.s32.totalorder %s136_s2, %s198_s15  ;;  %p204_p4 = scmp.lt.s32.totalorder %s198_s15, %s198_s15 }
  0x2a   :  { %v50_v19 = vld [vmem:[#allocation2 + $0x38] sm:$0xff]  ;;  %v51_v20 = vld [vmem:[#allocation2 + $0x40] sm:$0xff]  ;;  %v52_v21 = vld [vmem:[#allocation2 + $0x48] sm:$0xff] }
  0x2b   :  { %v57_v25 = vld [vmem:[#allocation5 + $0x10] sm:$0xff]  ;;  %v58_v26 = vld [vmem:[#allocation5 + $0x18] sm:$0xff]  ;;  %p205_p5 = por %p204_p4, %p203_p3 }
  0x2c   :  { %68 = vperm.xlu0 %153, %v60_v2   ;;  %v53_v31 = vld [vmem:[#allocation2 + $0x50] sm:$0xff]  ;;  %v54_v32 = vld [vmem:[#allocation2 + $0x58] sm:$0xff] }
  0x2d   :  { %p206_p6 = pnand %p205_p5, %p199_p2 }
  0xa7   :  { %v64_v9 = vpop.permute.xlu0 %63 }
  0xa8   :  { %v71_v12 = vmul.f32 %v64_v9, %v43_v3  ;;  %v72_v13 = vmul.f32 %v64_v9, %v44_v4  ;;  %v73_v14 = vmul.f32 %v64_v9, %v45_v5  ;;  %v74_v15 = vmul.f32 %v64_v9, %v46_v6 }
  0xa9   :  { %v75_v16 = vmul.f32 %v64_v9, %v47_v7  ;;  %v76_v17 = vmul.f32 %v64_v9, %v48_v8 }
  0xaa   :  { %v83_v22 = vsub.f32 %v71_v12, %v55_v10  ;;  %v84_v23 = vsub.f32 %v72_v13, %v56_v11  ;;  %v85_v27 = vsub.f32 %v73_v14, %v55_v10  ;;  %v86_v28 = vsub.f32 %v74_v15, %v56_v11 }
  0xab   :  { %v69_v24 = vpop.permute.xlu0 %68  ;;  %v87_v35 = vsub.f32 %v75_v16, %v55_v10  ;;  %v88_v36 = vsub.f32 %v76_v17, %v56_v11 }
  0xac   :  { %v77_v29 = vmul.f32 %v69_v24, %v49_v18  ;;  %v78_v30 = vmul.f32 %v69_v24, %v50_v19  ;;  %v79_v33 = vmul.f32 %v69_v24, %v51_v20  ;;  %v80_v34 = vmul.f32 %v69_v24, %v52_v21 }
  0xad   :  { %v95_v39 = vmul.f32 %v83_v22, %v83_v22  ;;  %v96_v40 = vmul.f32 %v84_v23, %v84_v23  ;;  %v97_v41 = vmul.f32 %v85_v27, %v85_v27  ;;  %v98_v42 = vmul.f32 %v86_v28, %v86_v28 }
  0xae   :  { %v89_v37 = vsub.f32 %v77_v29, %v57_v25  ;;  %v90_v38 = vsub.f32 %v78_v30, %v58_v26  ;;  %v81_v43 = vmul.f32 %v69_v24, %v53_v31  ;;  %v82_v44 = vmul.f32 %v69_v24, %v54_v32 }
  0xaf   :  { %v91_v45 = vsub.f32 %v79_v33, %v57_v25  ;;  %v92_v46 = vsub.f32 %v80_v34, %v58_v26  ;;  %v99_v47 = vmul.f32 %v87_v35, %v87_v35  ;;  %v100_v48 = vmul.f32 %v88_v36, %v88_v36 }
  0xb0   :  { %v101_v49 = vmul.f32 %v89_v37, %v89_v37  ;;  %v102_v50 = vmul.f32 %v90_v38, %v90_v38  ;;  %v107_v51 = vadd.f32 %v97_v41, %v95_v39  ;;  %v112_v52 = vadd.f32 %v98_v42, %v96_v40 }
  0xb1   :  { %v93_v53 = vsub.f32 %v81_v43, %v57_v25  ;;  %v94_v54 = vsub.f32 %v82_v44, %v58_v26  ;;  %v103_v57 = vmul.f32 %v91_v45, %v91_v45  ;;  %v104_v58 = vmul.f32 %v92_v46, %v92_v46 }
  0xb2   :  { %v108_v55 = vadd.f32 %v107_v51, %v99_v47  ;;  %v113_v56 = vadd.f32 %v112_v52, %v100_v48 }
  0xb3   :  { %v105_v61 = vmul.f32 %v93_v53, %v93_v53  ;;  %v106_v62 = vmul.f32 %v94_v54, %v94_v54 }
  0xb4   :  { %v109_v59 = vadd.f32 %v108_v55, %v101_v49  ;;  %v114_v60 = vadd.f32 %v113_v56, %v102_v50 }
  0xb6   :  { %v110_v63 = vadd.f32 %v109_v59, %v103_v57  ;;  %v115_v0 = vadd.f32 %v114_v60, %v104_v58 }
  0xb8   :  { %v111_v1 = vadd.f32 %v110_v63, %v105_v61  ;;  %v116_v2 = vadd.f32 %v115_v0, %v106_v62 }
  0xba   :  { %v117_v3 = vadd.f32 %v116_v2, %v111_v1 }
  0xbc   :  { %118 = vadd.xlane.f32.xlu1 %v117_v3 }
 0x149   :  { %v119_v4 = vpop.xlane.xlu1 %118 }
 0x14a   :  { %v120_v5 = vrot.slane %v119_v4, 4 }
 0x14c   :  { %v121_v6 = vadd.f32 %v120_v5, %v119_v4 }
 0x14e   :  { %v122_v7 = vrot.slane %v121_v6, 2 }
 0x150   :  { %v123_v8 = vadd.f32 %v122_v7, %v121_v6 }
 0x152   :  { %v124_v9 = vrot.slane %v123_v8, 1 }
 0x154   :  { %v125_v10 = vadd.f32 %v124_v9, %v123_v8 }
 0x156   :  { %145 = vpush %v125_v10 }
 0x187   :  { %s146_s14 = spop %145 }
 0x188   :  { %v127_v11 = vstv %s146_s14 }
 0x189   :  { %128 = vst [vmem:[#allocation7] sm:$0xff] %v127_v11 }
 0x18a   :  { %209 = shalt.err (!%p206_p6)
}
 0x18b   :  { %s210_s18 = scalar_lea.hbm %s297_s3, 128 }
 0x18c   :  { %p211_p7 = scmp.ne.s32.totalorder %s297_s3, %s210_s18  ;;  %p214_p8 = scmp.lt.u32.totalorder %s210_s18, %s297_s3 }
 0x18e   :  { %p216_p9 = pnand %p214_p8, %p211_p7 }
 0x190   :  { %219 = shalt.err (!%p216_p9)
}
 0x191   :  { %138 = dma.vmem_to_hbm [thread:$0]  %s136_s2, 128, %s297_s3, [#allocation4]  }
 0x192   :  { %224 = dma.done.wait [#allocation4], 128  }
 0x193   :  { %225 = vsyncadd [#allocation4], 4294967168 }
 0x194   :  { %142 = vsyncpa [#allocation3], 1 }
 0x195   :  { %143 = vsyncpa [#allocation6], 1 }
 0x196   :  { %144 = vsyncpa [#allocation4], 1 }

</bundles_post_ra>
